<compile_context>
chip_gen: v7x
topology: tpu7x:2x2x1
jax: 0.10.0
libtpu: 0.0.40
codegen_flags: <defaults>
</compile_context>

<pallas_src>
import functools

import jax
import jax.numpy as jnp
from jax.experimental import pallas as pl
from jax.experimental.pallas import tpu as pltpu


def _round_up(x, m):
    return ((x + m - 1) // m) * m


def _pick_tiling(n, hw, c, dp, kp, x_itemsize=2):
    """Batch tile + scoped-VMEM limit, retuned per TPU generation.

    Physical VMEM: 128 MiB (v5e/v6e) or 64 MiB (v7x); target ~75% of it.
    The double-buffered bf16 x tile gets ~1/3 of the budget; the resident
    (single-buffered) weights and the double-buffered outputs get the rest.
    """
    try:
        info = pltpu.get_tpu_info()
        phys = int(getattr(info, "vmem_capacity_bytes", 0)) or 64 * 2**20
    except Exception:                       # conservative fallback (v7x-sized)
        phys = 64 * 2**20
    limit = min(phys * 3 // 4, 96 * 2**20)  # ~96 MiB on v5e/v6e, ~48 MiB on v7x

    per_row_x = 2 * hw * c * x_itemsize     # double-buffered bf16 bytes per batch row
    t = max(1, (limit // 3) // per_row_x)
    t = min(t, 256, n)                      # 256 rows fills the v6e/v7x MXU
    if n >= 16:
        t = min(t, n // 2)                  # >=2 grid steps: feeds both v7x TCs + pipelining
        t = max(8, (t // 8) * 8)            # (8,128) constraint on output blocks
    else:
        t = n                               # tiny batch: block dim == full dim is allowed

    # Make sure the chosen tile actually fits under the scoped limit.
    need = (t * per_row_x                   # x double buffer
            + 2 * 2 * t * (dp + kp) * 4     # double-buffered f32 outputs
            + (c * dp + dp * kp) * 2        # resident bf16 weights (single-buffered)
            + (dp + kp) * 4                 # f32 biases
            + 4 * 2**20)                    # slack
    limit = min(max(limit, need), phys)
    return t, int(limit)


# ---------------------------------------------------------------------------
# Fused kernel: GAP -> Linear(C,Dp) + ReLU -> clip(max=thr) -> Linear(Dp,Kp)
# ---------------------------------------------------------------------------
def _react_fused_kernel(thr_ref, x_ref, w1_ref, b1_ref, wfc_ref, bfc_ref,
                        *out_refs, hw_inv, emit_feature):
    logits_ref = out_refs[0]

    # x tile: (tile_n, C, HW) bf16, native NCHW layout with HW on the lane
    # axis.  GAP = lane reduce with f32 accumulation; 1/HW folded in.
    x = x_ref[...].astype(jnp.float32)
    gap = jnp.sum(x, axis=2) * hw_inv                                 # (tile_n, C) f32

    # Backbone feature head: Linear(C, Dp) + ReLU (bf16 MXU, f32 accumulate).
    h = jnp.dot(gap.astype(jnp.bfloat16), w1_ref[...],
                preferred_element_type=jnp.float32) + b1_ref[...]
    feat = jnp.maximum(h, 0.0)

    # ReAct: feature.clip(max=threshold)  (threshold = +inf => plain forward).
    feat = jnp.minimum(feat, thr_ref[0])

    # Classifier head: Linear(Dp, Kp) (zero-padded widths, so padding is exact).
    logits_ref[...] = jnp.dot(feat.astype(jnp.bfloat16), wfc_ref[...],
                              preferred_element_type=jnp.float32) + bfc_ref[...]
    if emit_feature:
        out_refs[1][...] = feat


# ---------------------------------------------------------------------------
# Model wrapper
# ---------------------------------------------------------------------------
class ReactNet:
    """JAX/Pallas port of openood ReactNet (with a synthetic GAP+Linear backbone)."""

    def __init__(self, w1, b1, fc_w, fc_b):
        # Raw params (PyTorch layouts), kept for get_fc().
        self.fc_w = jnp.asarray(fc_w, dtype=jnp.float32)   # (K, D)
        self.fc_b = jnp.asarray(fc_b, dtype=jnp.float32)   # (K,)
        w1 = jnp.asarray(w1, dtype=jnp.float32)            # (C, D)
        b1 = jnp.asarray(b1, dtype=jnp.float32)            # (D,)

        self.c, self.d = w1.shape
        self.k = self.fc_w.shape[0]
        # Lane-dense padded widths (multiples of 128) -> unmasked vector stores.
        self.dp = max(128, _round_up(self.d, 128))
        self.kp = max(128, _round_up(self.k, 128))

        # One-time weight prep (pre-transpose + zero pad + bf16 cast); NOT on
        # the hot path.  bf16 operands hit the native MXU datapath; every
        # matmul accumulates in f32.
        self.w1_p = (jnp.zeros((self.c, self.dp), jnp.float32)
                     .at[:, :self.d].set(w1).astype(jnp.bfloat16))
        self.b1_p = jnp.zeros((1, self.dp), jnp.float32).at[:, :self.d].set(b1)
        self.wfc_p = (jnp.zeros((self.dp, self.kp), jnp.float32)
                      .at[:self.d, :self.k].set(self.fc_w.T).astype(jnp.bfloat16))
        self.bfc_p = jnp.zeros((1, self.kp), jnp.float32).at[:, :self.k].set(self.fc_b)

    # ---- fused forward path -------------------------------------------------
    def _run(self, x_nchw, threshold, emit_feature):
        n, c, h, w = x_nchw.shape
        assert c == self.c, "channel mismatch with backbone weights"
        hw = h * w

        # Native NCHW kept as (N, C, HW): merging trailing dims is a free
        # metadata reshape (no HBM shuffle pass), and HW lands on the lane
        # axis so the in-kernel GAP reduce is lane-dense even when C < 128.
        # bf16 halves the dominant x DMA bytes (ideally the producer already
        # emits bf16, making this cast a no-op).
        x3d = x_nchw.reshape(n, c, hw).astype(jnp.bfloat16)

        tile_n, vmem_limit = _pick_tiling(n, hw, c, self.dp, self.kp)
        num_tiles = pl.cdiv(n, tile_n)
        # No batch padding: rows are independent, so the ragged last tile's
        # out-of-bounds rows are simply dropped on store by Pallas.

        thr = jnp.asarray([threshold], dtype=jnp.float32)

        # Resident params: whole-array VMEM specs -> loaded once, single
        # buffered, never refetched across grid steps.
        resident = pl.BlockSpec(memory_space=pltpu.MemorySpace.VMEM)
        in_specs = [
            pl.BlockSpec(memory_space=pltpu.MemorySpace.SMEM),        # threshold scalar
            pl.BlockSpec((tile_n, c, hw), lambda i: (i, 0, 0)),       # x tile (pipelined)
            resident,                                                 # W1   (C, Dp)  bf16
            resident,                                                 # b1   (1, Dp)  f32
            resident,                                                 # WfcT (Dp, Kp) bf16
            resident,                                                 # bfc  (1, Kp)  f32
        ]
        # TODO(synk): if xprof still shows exposed x DMA at large N, sweep
        # pipeline_mode=pl.Buffered(3) on the x BlockSpec.

        if emit_feature:
            out_shape = (jax.ShapeDtypeStruct((n, self.kp), jnp.float32),
                         jax.ShapeDtypeStruct((n, self.dp), jnp.float32))
            out_specs = (pl.BlockSpec((tile_n, self.kp), lambda i: (i, 0)),
                         pl.BlockSpec((tile_n, self.dp), lambda i: (i, 0)))
        else:
            out_shape = jax.ShapeDtypeStruct((n, self.kp), jnp.float32)
            out_specs = pl.BlockSpec((tile_n, self.kp), lambda i: (i, 0))

        out = pl.pallas_call(
            functools.partial(_react_fused_kernel, hw_inv=1.0 / hw,
                              emit_feature=emit_feature),
            grid=(num_tiles,),
            in_specs=in_specs,
            out_specs=out_specs,
            out_shape=out_shape,
            compiler_params=pltpu.CompilerParams(
                dimension_semantics=("parallel",),   # batch tiles -> both v7x TCs
                vmem_limit_bytes=vmem_limit,
            ),
        )(thr, x3d, self.w1_p, self.b1_p, self.wfc_p, self.bfc_p)

        if emit_feature:
            logits_p, feat_p = out
            return logits_p[:, :self.k], feat_p[:, :self.d]
        return out[:, :self.k], None

    # ---- public API (matches the PyTorch module) ----------------------------
    def forward(self, x, return_feature=False, return_feature_list=False):
        need_feat = return_feature or return_feature_list
        logits, feat = self._run(x, jnp.inf, emit_feature=need_feat)   # no clipping
        if return_feature:
            return logits, feat
        if return_feature_list:
            return logits, [feat]
        return logits

    def forward_threshold(self, x, threshold, return_feature=True):
        logits, feat = self._run(x, threshold, emit_feature=return_feature)
        if return_feature:
            return logits, feat                # feat is already (N, D) = view(N, -1)
        return logits

    def get_fc(self):
        return (jax.device_get(self.fc_w), jax.device_get(self.fc_b))


# ---------------------------------------------------------------------------
if __name__ == "__main__":
    key = jax.random.PRNGKey(0)
    k_x, k_w1, k_b1, k_fw, k_fb = jax.random.split(key, 5)

    N, C, H, W = 2, 4, 16, 16        # small NCHW input
    D, K = 32, 10                    # feature dim, num classes

    x = jax.random.normal(k_x, (N, C, H, W), dtype=jnp.float32)
    w1 = jax.random.normal(k_w1, (C, D), dtype=jnp.float32) * 0.1
    b1 = jax.random.normal(k_b1, (D,), dtype=jnp.float32) * 0.1
    fc_w = jax.random.normal(k_fw, (K, D), dtype=jnp.float32) * 0.1
    fc_b = jax.random.normal(k_fb, (K,), dtype=jnp.float32) * 0.1

    net = ReactNet(w1, b1, fc_w, fc_b)

    threshold = 0.05
    logits_thr, feature_thr = net.forward_threshold(x, threshold, return_feature=True)
    logits_plain = net.forward(x)                       # no-feature variant (no feat writeback)
    logits_rf, feature_rf = net.forward(x, return_feature=True)
    jax.block_until_ready((logits_thr, feature_thr, logits_plain, logits_rf, feature_rf))

    # plain-JAX f32 reference (kernel runs a bf16-operand / f32-accumulate path,
    # so tolerances are loosened accordingly)
    gap = x.reshape(N, C, H * W).mean(-1)               # (N, C)
    feat_ref = jnp.maximum(gap @ w1 + b1, 0.0)          # (N, D)
    feat_clip_ref = jnp.minimum(feat_ref, threshold)
    logits_thr_ref = feat_clip_ref @ fc_w.T + fc_b
    logits_plain_ref = feat_ref @ fc_w.T + fc_b

    ATOL = RTOL = 2e-2
    assert logits_thr.shape == (N, K) and feature_thr.shape == (N, D)
    assert jnp.allclose(feature_thr, feat_clip_ref, atol=ATOL, rtol=RTOL)
    assert jnp.allclose(logits_thr, logits_thr_ref, atol=ATOL, rtol=RTOL)
    assert jnp.allclose(logits_plain, logits_plain_ref, atol=ATOL, rtol=RTOL)
    assert jnp.allclose(feature_rf, feat_ref, atol=ATOL, rtol=RTOL)
    assert jnp.allclose(logits_rf, logits_plain_ref, atol=ATOL, rtol=RTOL)

    print("KERNEL_OK")
</pallas_src>

<mosaic_0001>
module attributes {stable_mosaic.version = 11 : i64} {
  func.func @_react_fused_kernel(%arg0: i32, %arg1: memref<1xf32, #tpu.memory_space<smem>>, %arg2: memref<2x4x256xbf16, #tpu.memory_space<vmem>>, %arg3: memref<4x128xbf16, #tpu.memory_space<vmem>>, %arg4: memref<1x128xf32, #tpu.memory_space<vmem>>, %arg5: memref<128x128xbf16, #tpu.memory_space<vmem>>, %arg6: memref<1x128xf32, #tpu.memory_space<vmem>>, %arg7: memref<2x128xf32, #tpu.memory_space<vmem>>, %arg8: memref<2x128xf32, #tpu.memory_space<vmem>>) attributes {dimension_semantics = [#tpu.dimension_semantics<parallel>], iteration_bounds = array<i64: 1>, scalar_prefetch = 0 : i64, scratch_operands = 0 : i64, tpu.core_type = #tpu.core_type<tc>, window_params = [{transform_indices = @transform_0, window_bounds = array<i64: 1>}, {transform_indices = @transform_1, window_bounds = array<i64: 2, 4, 256>}, {pipeline_mode = #tpu.pipeline_mode<synchronous>, transform_indices = @transform_2, window_bounds = array<i64: 4, 128>}, {pipeline_mode = #tpu.pipeline_mode<synchronous>, transform_indices = @transform_3, window_bounds = array<i64: 1, 128>}, {pipeline_mode = #tpu.pipeline_mode<synchronous>, transform_indices = @transform_4, window_bounds = array<i64: 128, 128>}, {pipeline_mode = #tpu.pipeline_mode<synchronous>, transform_indices = @transform_5, window_bounds = array<i64: 1, 128>}, {transform_indices = @transform_6, window_bounds = array<i64: 2, 128>}, {transform_indices = @transform_7, window_bounds = array<i64: 2, 128>}]} {
    %c0 = arith.constant 0 : index
    %c0_0 = arith.constant 0 : index
    %c0_1 = arith.constant 0 : index
    %0 = vector.load %arg2[%c0, %c0_0, %c0_1] : memref<2x4x256xbf16, #tpu.memory_space<vmem>>, vector<2x4x256xbf16>
    %1 = arith.extf %0 : vector<2x4x256xbf16> to vector<2x4x256xf32>
    %cst = arith.constant dense<0.000000e+00> : vector<2x4xf32>
    %2 = vector.multi_reduction <add>, %1, %cst [2] : vector<2x4x256xf32> to vector<2x4xf32>
    %cst_2 = arith.constant 3.906250e-03 : f32
    %3 = vector.broadcast %cst_2 : f32 to vector<2x4xf32>
    %4 = arith.mulf %2, %3 : vector<2x4xf32>
    %5 = arith.truncf %4 : vector<2x4xf32> to vector<2x4xbf16>
    %c0_3 = arith.constant 0 : index
    %c0_4 = arith.constant 0 : index
    %6 = vector.load %arg3[%c0_3, %c0_4] : memref<4x128xbf16, #tpu.memory_space<vmem>>, vector<4x128xbf16>
    %cst_5 = arith.constant dense<0.000000e+00> : vector<2x128xf32>
    %7 = tpu.matmul %5, %6, %cst_5 {dimension_numbers = #tpu.dot_dimension_numbers<[1], [0], [0], [1], [0, 0, 1, 1], [], []>} : vector<2x4xbf16>, vector<4x128xbf16>, vector<2x128xf32> -> vector<2x128xf32>
    %c0_6 = arith.constant 0 : index
    %c0_7 = arith.constant 0 : index
    %8 = vector.load %arg4[%c0_6, %c0_7] : memref<1x128xf32, #tpu.memory_space<vmem>>, vector<1x128xf32>
    %9 = vector.broadcast %8 : vector<1x128xf32> to vector<2x128xf32>
    %10 = arith.addf %7, %9 : vector<2x128xf32>
    %cst_8 = arith.constant 0.000000e+00 : f32
    %11 = vector.broadcast %cst_8 : f32 to vector<2x128xf32>
    %12 = arith.maximumf %10, %11 : vector<2x128xf32>
    %c0_9 = arith.constant 0 : index
    %13 = memref.load %arg1[%c0_9] : memref<1xf32, #tpu.memory_space<smem>>
    %14 = vector.broadcast %13 : f32 to vector<2x128xf32>
    %15 = arith.minimumf %12, %14 : vector<2x128xf32>
    %16 = arith.truncf %15 : vector<2x128xf32> to vector<2x128xbf16>
    %c0_10 = arith.constant 0 : index
    %c0_11 = arith.constant 0 : index
    %17 = vector.load %arg5[%c0_10, %c0_11] : memref<128x128xbf16, #tpu.memory_space<vmem>>, vector<128x128xbf16>
    %cst_12 = arith.constant dense<0.000000e+00> : vector<2x128xf32>
    %18 = tpu.matmul %16, %17, %cst_12 {dimension_numbers = #tpu.dot_dimension_numbers<[1], [0], [0], [1], [0, 0, 1, 1], [], []>} : vector<2x128xbf16>, vector<128x128xbf16>, vector<2x128xf32> -> vector<2x128xf32>
    %c0_13 = arith.constant 0 : index
    %c0_14 = arith.constant 0 : index
    %19 = vector.load %arg6[%c0_13, %c0_14] : memref<1x128xf32, #tpu.memory_space<vmem>>, vector<1x128xf32>
    %20 = vector.broadcast %19 : vector<1x128xf32> to vector<2x128xf32>
    %21 = arith.addf %18, %20 : vector<2x128xf32>
    %c0_15 = arith.constant 0 : index
    %c0_16 = arith.constant 0 : index
    %22 = vector.load %arg7[%c0_15, %c0_16] : memref<2x128xf32, #tpu.memory_space<vmem>>, vector<2x128xf32>
    tpu.vector_store %arg7[%c0_15, %c0_16], %21 {strides = array<i32>} : memref<2x128xf32, #tpu.memory_space<vmem>>, vector<2x128xf32>,
    %c0_17 = arith.constant 0 : index
    %c0_18 = arith.constant 0 : index
    %23 = vector.load %arg8[%c0_17, %c0_18] : memref<2x128xf32, #tpu.memory_space<vmem>>, vector<2x128xf32>
    tpu.vector_store %arg8[%c0_17, %c0_18], %15 {strides = array<i32>} : memref<2x128xf32, #tpu.memory_space<vmem>>, vector<2x128xf32>,
    return
  }
  func.func @transform_0(%arg0: i32) -> i32 {
    %c0_i32 = arith.constant 0 : i32
    %c0_i32_0 = arith.constant 0 : i32
    return %c0_i32 : i32
  }
  func.func @transform_1(%arg0: i32) -> (i32, i32, i32) {
    %c0_i32 = arith.constant 0 : i32
    %c0_i32_0 = arith.constant 0 : i32
    %c0_i32_1 = arith.constant 0 : i32
    return %arg0, %c0_i32, %c0_i32_0 : i32, i32, i32
  }
  func.func @transform_2(%arg0: i32) -> (i32, i32) {
    %c0_i32 = arith.constant 0 : i32
    %c0_i32_0 = arith.constant 0 : i32
    %c0_i32_1 = arith.constant 0 : i32
    return %c0_i32, %c0_i32_0 : i32, i32
  }
  func.func @transform_3(%arg0: i32) -> (i32, i32) {
    %c0_i32 = arith.constant 0 : i32
    %c0_i32_0 = arith.constant 0 : i32
    %c0_i32_1 = arith.constant 0 : i32
    return %c0_i32, %c0_i32_0 : i32, i32
  }
  func.func @transform_4(%arg0: i32) -> (i32, i32) {
    %c0_i32 = arith.constant 0 : i32
    %c0_i32_0 = arith.constant 0 : i32
    %c0_i32_1 = arith.constant 0 : i32
    return %c0_i32, %c0_i32_0 : i32, i32
  }
  func.func @transform_5(%arg0: i32) -> (i32, i32) {
    %c0_i32 = arith.constant 0 : i32
    %c0_i32_0 = arith.constant 0 : i32
    %c0_i32_1 = arith.constant 0 : i32
    return %c0_i32, %c0_i32_0 : i32, i32
  }
  func.func @transform_6(%arg0: i32) -> (i32, i32) {
    %c0_i32 = arith.constant 0 : i32
    %c0_i32_0 = arith.constant 0 : i32
    return %arg0, %c0_i32 : i32, i32
  }
  func.func @transform_7(%arg0: i32) -> (i32, i32) {
    %c0_i32 = arith.constant 0 : i32
    %c0_i32_0 = arith.constant 0 : i32
    return %arg0, %c0_i32 : i32, i32
  }
}

</mosaic_0001>

<bundles_post_ra>
// kernel: tpu_custom_call.1
= control target key start
LH: loop header
LB: loop body
LE: loop exit
PB: predicated region body
PF: predicated region fallthrough
CT: control target
= control target key end

     0   :  { %14 = vsyncpa [#allocation4], 0  ;;  %s575_s0 = inlined_call_operand.<no memory space> [shape: f32[1], index: 0, kind: input, shape index: {}]   ;;  %s576_s1 = inlined_call_operand.hbm [shape: bf16[2,4,256], index: 1, kind: input, shape index: {}]   ;;  %s577_s2 = inlined_call_operand.vmem [shape: bf16[4,128], index: 2, kind: input, shape index: {}]   ;;  %s578_s3 = inlined_call_operand.vmem [shape: f32[1,128], index: 3, kind: input, shape index: {}]   ;;  %s579_s4 = inlined_call_operand.hbm [shape: bf16[128,128], index: 4, kind: input, shape index: {}]   ;;  %s580_s5 = inlined_call_operand.vmem [shape: f32[1,128], index: 5, kind: input, shape index: {}]   ;;  %s581_s6 = inlined_call_operand.hbm [shape: f32[2,128], index: 6, kind: output, shape index: {0}]   ;;  %s582_s7 = inlined_call_operand.hbm [shape: f32[2,128], index: 7, kind: output, shape index: {1}]  }
   0x1   :  { %15 = vsyncpa [#allocation7], 0 }
   0x2   :  { %16 = vsyncpa [#allocation5], 0 }
   0x3   :  { %17 = vsyncpa [#allocation10], 0  ;;  %s467_s24 = smov [#allocation3]   ;;  %s371_s28 = scalar_lea.hbm %s576_s1, 128 }
   0x4   :  { %s25_s25 = sshll.u32 %s467_s24, 4  ;;  %p372_p0 = scmp.ne.s32.totalorder %s576_s1, %s371_s28  ;;  %s26_s25 = int_to_ptr.vmem [resolvable:$true] %s25_s25 }
   0x5   :  { %p375_p1 = scmp.lt.u32.totalorder %s371_s28, %s576_s1 }
   0x7   :  { %p377_p2 = pnand %p375_p1, %p372_p0 }
   0x9   :  { %380 = shalt.err (!%p377_p2)
}
   0xa   :  { %s381_s10 = scalar_lea.vmem %s26_s25, 128  ;;  %p386_p4 = scmp.lt.s32.totalorder %s26_s25, %s26_s25 }
   0xb   :  { %p382_p3 = scmp.ne.s32.totalorder %s26_s25, %s381_s10  ;;  %p387_p5 = scmp.lt.s32.totalorder %s381_s10, %s381_s10 }
   0xd   :  { %p388_p6 = por %p387_p5, %p386_p4 }
   0xf   :  { %p389_p7 = pnand %p388_p6, %p382_p3 }
  0x11   :  { %392 = shalt.err (!%p389_p7)
}
  0x12   :  { %s468_s11 = smov 64   ;;  %s469_s12 = smov 4  }
  0x13   :  { %31 = dma.hbm_to_vmem [thread:$0]  %s576_s1, 128, %s26_s25, [#allocation4], %s468_s11, %s468_s11, %s469_s12  }
  0x14   :  { %s470_s15 = smov [#allocation6]   ;;  %s393_s19 = scalar_lea.hbm %s579_s4, 1024 }
  0x15   :  { %s41_s16 = sshll.u32 %s470_s15, 4  ;;  %p394_p8 = scmp.ne.s32.totalorder %s579_s4, %s393_s19  ;;  %s42_s16 = int_to_ptr.vmem [resolvable:$true] %s41_s16 }
  0x16   :  { %p397_p9 = scmp.lt.u32.totalorder %s393_s19, %s579_s4 }
  0x18   :  { %p399_p10 = pnand %p397_p9, %p394_p8 }
  0x1a   :  { %402 = shalt.err (!%p399_p10)
}
  0x1b   :  { %s403_s24 = scalar_lea.vmem %s42_s16, 1024  ;;  %p408_p12 = scmp.lt.s32.totalorder %s42_s16, %s42_s16 }
  0x1c   :  { %p404_p11 = scmp.ne.s32.totalorder %s42_s16, %s403_s24  ;;  %p409_p13 = scmp.lt.s32.totalorder %s403_s24, %s403_s24 }
  0x1e   :  { %p410_p0 = por %p409_p13, %p408_p12 }
  0x20   :  { %p411_p1 = pnand %p410_p0, %p404_p11 }
  0x22   :  { %414 = shalt.err (!%p411_p1)
}
  0x23   :  { %47 = dma.hbm_to_vmem [thread:$0]  %s579_s4, 1024, %s42_s16, [#allocation7], %s468_s11, %s468_s11, %s469_s12  }
  0x24   :  { %459 = dma.done.wait [#allocation4], 128  }
  0x25   :  { %460 = vsyncadd [#allocation4], 4294967168 }
  0x26   :  { %461 = dma.done.wait [#allocation7], 1024  }
  0x27   :  { %462 = vsyncadd [#allocation7], 4294966272  ;;  %v315_v0 = vld [vmem:[#allocation3] sm:$0xff]   ;;  %vm67_vm0 = vcmask 1043456   ;;  %vm111_vm1 = vcmask 1041408   ;;  %v471_v12 = vmov 0.0   ;;  %v94_v20 = vlaneseq }
  0x28   :  { %v316_v1 = vunpack.c.l.bf16 %v315_v0  ;;  %v317_v2 = vunpack.c.h.bf16 %v315_v0  ;;  %v82_v11 = vld [vmem:[%s577_s2] sm:$0x3]  ;;  %329 = vmatprep.subr.bf16.mxu0 %v471_v12  ;;  %335 = vmatprep.subr.bf16.mxu1 %v471_v12  ;;  %vm472_vm2 = vmmov 0   ;;  %v363_v14 = vld [vmem:[#allocation6] sm:$0xff]   ;;  %v364_v15 = vld [vmem:[#allocation6 + $0x8] sm:$0xff]   ;;  %vm104_vm3 = vcmask 1041409  }
  0x29   :  { %v113_v13 = vsel %vm111_vm1, %v82_v11, 0  ;;  %331 = vmatprep.mubr.msk.bf16.mxu0 %vm472_vm2, %v471_v12  ;;  %351 = vmatprep.mubr.msk.bf16.mxu1 %vm472_vm2, %v471_v12  ;;  %v365_v16 = vld [vmem:[#allocation6 + $0x10] sm:$0xff]   ;;  %v366_v17 = vld [vmem:[#allocation6 + $0x18] sm:$0xff]   ;;  %v367_v18 = vld [vmem:[#allocation6 + $0x20] sm:$0xff]   ;;  %v95_v23 = vand.u32 127, %v94_v20  ;;  %v97_v24 = vshrl.u32 %v94_v20, 7  ;;  %v157_v42 = vstv %s575_s0 }
  0x2a   :  { %v63_v3 = vcombine.high %v316_v1, %v316_v1  ;;  %v68_v4 = vsel %vm67_vm0, %v316_v1, 0.0  ;;  %v64_v5 = vcombine.high %v317_v2, %v317_v2  ;;  %v73_v6 = vsel %vm67_vm0, %v317_v2, 0.0  ;;  %330 = vmatpush3.bf16.msra.mxu0 %v113_v13  ;;  %336 = vmatpush3.bf16.msra.mxu1 %v363_v14  ;;  %v368_v19 = vld [vmem:[#allocation6 + $0x28] sm:$0xff]   ;;  %v369_v36 = vld [vmem:[#allocation6 + $0x30] sm:$0xff]   ;;  %v370_v37 = vld [vmem:[#allocation6 + $0x38] sm:$0xff]   ;;  %s473_s30 = smov [#allocation9]  }
  0x2b   :  { %337 = vmatprep.subr.bf16.mxu1 %v471_v12  ;;  %v98_v28 = vsub.s32 %v95_v23, %v97_v24  ;;  %vm107_vm4 = vcmask 31744   ;;  %v303_v38 = vld [vmem:[%s578_s3] ss:$0 sm:$0xff]  ;;  %s289_s8 = sshll.u32 %s473_s30, 4  ;;  %s290_s8 = int_to_ptr.vmem [resolvable:$true] %s289_s8 }
  0x2c   :  { %v69_v7 = vsel %vm67_vm0, %v63_v3, 0.0  ;;  %v74_v8 = vsel %vm67_vm0, %v64_v5, 0.0  ;;  %s415_s9 = scalar_lea.vmem %s290_s8, 32  ;;  %p420_p3 = scmp.lt.s32.totalorder %s290_s8, %s290_s8 }
  0x2d   :  { %v70_v9 = vadd.f32 %v69_v7, %v68_v4  ;;  %v75_v10 = vadd.f32 %v74_v8, %v73_v6  ;;  %p416_p2 = scmp.ne.s32.totalorder %s290_s8, %s415_s9  ;;  %p421_p4 = scmp.lt.s32.totalorder %s415_s9, %s415_s9 }
  0x2e   :  { %338 = vmatpush3.bf16.msra.mxu1 %v364_v15 }
  0x2f   :  { %71 = vadd.xlane.f32.xlu0 %v70_v9  ;;  %339 = vmatprep.subr.bf16.mxu1 %v471_v12  ;;  %p422_p5 = por %p421_p4, %p420_p3 }
  0x31   :  { %p423_p6 = pnand %p422_p5, %p416_p2 }
  0x32   :  { %340 = vmatpush3.bf16.msra.mxu1 %v365_v16 }
  0x33   :  { %76 = vadd.xlane.f32.xlu0 %v75_v10  ;;  %341 = vmatprep.subr.bf16.mxu1 %v471_v12 }
  0x36   :  { %342 = vmatpush3.bf16.msra.mxu1 %v366_v17 }
  0x37   :  { %343 = vmatprep.subr.bf16.mxu1 %v471_v12 }
  0x3a   :  { %344 = vmatpush3.bf16.msra.mxu1 %v367_v18 }
  0x3b   :  { %345 = vmatprep.subr.bf16.mxu1 %v471_v12 }
  0x3e   :  { %346 = vmatpush3.bf16.msra.mxu1 %v368_v19 }
  0x3f   :  { %347 = vmatprep.subr.bf16.mxu1 %v471_v12 }
  0x42   :  { %348 = vmatpush3.bf16.msra.mxu1 %v369_v36 }
  0x43   :  { %349 = vmatprep.subr.bf16.mxu1 %v471_v12 }
  0x46   :  { %350 = vmatpush3.bf16.msra.mxu1 %v370_v37 }
  0xbc   :  { %v72_v21 = vpop.xlane.xlu0 %71 }
  0xbd   :  { %v78_v22 = vmul.f32 0.00390625, %v72_v21 }
  0xbf   :  { %v80_v25 = vpack.c.bf16 %v78_v22, %v78_v22 }
  0xc0   :  { %v77_v26 = vpop.xlane.xlu0 %76 }
  0xc1   :  { %v79_v27 = vmul.f32 0.00390625, %v77_v26  ;;  %v92_v29 = vunpack.c.l.b16 %v80_v25 }
  0xc3   :  { %v81_v30 = vpack.c.bf16 %v79_v27, %v79_v27  ;;  %v99_v32 = vrot.slane %v92_v29, %v98_v28 }
  0xc5   :  { %v93_v31 = vunpack.c.l.b16 %v81_v30 }
  0xc7   :  { %v103_v33 = vrot.slane %v93_v31, %v98_v28 }
  0xc9   :  { %v105_v34 = vsel %vm104_vm3, %v103_v33, %v99_v32 }
  0xca   :  { %v106_v35 = vpack.c.b16 %v105_v34, %v105_v34 }
  0xcc   :  { %332 = vmatmul.mubr.msk.bf16.vlgmr.msra.gmra.mrb[0].mxu0 %vm107_vm4, %v106_v35 }
 0x19f   :  { %v149_v39 = vpop.f32.mrb[0].mxu0 }
 0x1a0   :  { %v150_v40 = vadd.f32 %v303_v38, %v149_v39  ;;  %v333_v41 = vpop.f32.mrb[1].mxu0 }
 0x1a1   :  { %v152_v43 = vpop.f32.mrb[2].mxu0 }
 0x1a2   :  { %v155_v44 = vmax.f32 %v150_v40, 0.0  ;;  %v334_v45 = vpop.f32.mrb[3].mxu0 }
 0x1a4   :  { %v158_v46 = vmin.f32 %v155_v44, %v157_v42 }
 0x1a6   :  { %272 = vst [vmem:[#allocation9] sm:$0x3] %v158_v46  ;;  %v159_v47 = vpack.c.bf16 %v158_v46, %v158_v46 }
 0x1a8   :  { %352 = vmatmul.mubr.bf16.vlgmr.msra.gmra.mrb[0].mxu1 %v159_v47 }
 0x1a9   :  { %426 = shalt.err (!%p423_p6)
}
 0x1aa   :  { %s427_s0 = scalar_lea.hbm %s582_s7, 32 }
 0x1ab   :  { %p428_p7 = scmp.ne.s32.totalorder %s582_s7, %s427_s0  ;;  %p431_p8 = scmp.lt.u32.totalorder %s427_s0, %s582_s7 }
 0x1ad   :  { %p433_p9 = pnand %p431_p8, %p428_p7 }
 0x1af   :  { %436 = shalt.err (!%p433_p9)
}
 0x1b0   :  { %292 = dma.vmem_to_hbm [thread:$0]  %s290_s8, 32, %s582_s7, [#allocation10]   ;;  %v305_v48 = vld [vmem:[%s580_s5] ss:$0 sm:$0xff] }
 0x1b1   :  { %s474_s19 = smov [#allocation8]  }
 0x1b2   :  { %s279_s20 = sshll.u32 %s474_s19, 4  ;;  %s280_s20 = int_to_ptr.vmem [resolvable:$true] %s279_s20 }
 0x1b3   :  { %s437_s21 = scalar_lea.vmem %s280_s20, 32  ;;  %p442_p11 = scmp.lt.s32.totalorder %s280_s20, %s280_s20 }
 0x1b4   :  { %p438_p10 = scmp.ne.s32.totalorder %s280_s20, %s437_s21  ;;  %p443_p12 = scmp.lt.s32.totalorder %s437_s21, %s437_s21 }
 0x1b6   :  { %p444_p13 = por %p443_p12, %p442_p11 }
 0x1b8   :  { %p445_p0 = pnand %p444_p13, %p438_p10 }
 0x27b   :  { %v265_v49 = vpop.f32.mrb[0].mxu1 }
 0x27c   :  { %v266_v50 = vadd.f32 %v305_v48, %v265_v49  ;;  %v353_v51 = vpop.f32.mrb[1].mxu1 }
 0x27d   :  { %v268_v52 = vpop.f32.mrb[2].mxu1 }
 0x27e   :  { %271 = vst [vmem:[#allocation8] sm:$0x3] %v266_v50  ;;  %v354_v53 = vpop.f32.mrb[3].mxu1 }
 0x27f   :  { %448 = shalt.err (!%p445_p0)
}
 0x280   :  { %s449_s5 = scalar_lea.hbm %s581_s6, 32 }
 0x281   :  { %p450_p1 = scmp.ne.s32.totalorder %s581_s6, %s449_s5  ;;  %p453_p2 = scmp.lt.u32.totalorder %s449_s5, %s581_s6 }
 0x283   :  { %p455_p3 = pnand %p453_p2, %p450_p1 }
 0x285   :  { %458 = shalt.err (!%p455_p3)
}
 0x286   :  { %282 = dma.vmem_to_hbm [thread:$0]  %s280_s20, 32, %s581_s6, [#allocation5]  }
 0x287   :  { %463 = dma.done.wait [#allocation5], 32  }
 0x288   :  { %464 = vsyncadd [#allocation5], 4294967264 }
 0x289   :  { %465 = dma.done.wait [#allocation10], 32  }
 0x28a   :  { %466 = vsyncadd [#allocation10], 4294967264 }
 0x28b   :  { %299 = vsyncpa [#allocation4], 1 }
 0x28c   :  { %300 = vsyncpa [#allocation7], 1 }
 0x28d   :  { %301 = vsyncpa [#allocation5], 1 }
 0x28e   :  { %302 = vsyncpa [#allocation10], 1 }

</bundles_post_ra>
